<compile_context>
chip_gen: v7x
topology: tpu7x:2x2x1
jax: 0.10.0
libtpu: 0.0.40
codegen_flags: <defaults>
</compile_context>

<pallas_src>
import jax
import jax.numpy as jnp
from jax.experimental import pallas as pl
from jax.experimental.pallas import tpu as pltpu

C1, C2, C3 = 1.0, 10.0, 0.1


def memguard_kernel(err_ref, logits_ref, lab_ref, w1t_ref, p_ref, out_ref):
    # Tiles are (C, Bt): classes on sublanes, batch rows on lanes.
    logits = logits_ref[...]                                 # (C, Bt)
    z = logits + err_ref[...]                                # (C, Bt)

    # softmax(z) over classes (sublane reduction); keep zs for L2 (shift-invariant).
    zs = z - jnp.max(z, axis=0, keepdims=True)
    ez = jnp.exp(zs)
    soft_ze = ez / jnp.sum(ez, axis=0, keepdims=True)        # (C, Bt)

    # softmax(logits), recomputed in-kernel with the same formulation (drops the
    # third HBM input stream; exp/divide sit on otherwise idle EUP/VPU slots).
    ls = logits - jnp.max(logits, axis=0, keepdims=True)
    el = jnp.exp(ls)
    soft_z = el / jnp.sum(el, axis=0, keepdims=True)         # (C, Bt)

    # Defense model forward: Linear(C->H) -> ReLU -> Linear(H->1), batch on lanes.
    b1 = p_ref[:, 0:1]                                       # (H, 1)
    w2 = p_ref[:, 1:2]                                       # (H, 1)
    b2 = p_ref[0:1, 2:3]                                     # (1, 1)
    h = jnp.dot(w1t_ref[...], soft_ze, preferred_element_type=jnp.float32) + b1
    h = jnp.maximum(h, 0.0)                                  # (H, Bt)
    # (1,H) @ (H,Bt) done as VPU multiply + short sublane reduce (MXU off this chain).
    new_logits = jnp.sum(h * w2, axis=0, keepdims=True) + b2
    L1 = jnp.abs(new_logits)                                 # (1, Bt)

    # L2 = relu(max_{j != l} z[j] - z[l]); requires label in [0, C).
    lab = lab_ref[...]                                       # (1, Bt) int32
    row = jax.lax.broadcasted_iota(jnp.int32, zs.shape, 0)   # (C, Bt)
    is_l = row == lab
    z_l = jnp.max(jnp.where(is_l, zs, -jnp.inf), axis=0, keepdims=True)
    max_other = jnp.max(jnp.where(is_l, -jnp.inf, zs), axis=0, keepdims=True)
    L2 = jnp.maximum(max_other - z_l, 0.0)                   # (1, Bt)

    # L3 = sum_j |softmax(z)_j - softmax(logits)_j| per row.
    L3 = jnp.sum(jnp.abs(soft_ze - soft_z), axis=0, keepdims=True)

    out_ref[...] = C1 * L1 + C2 * L2 + C3 * L3               # (1, Bt) lane-dense store


def _round_up(x, m):
    return ((x + m - 1) // m) * m


def memguard_loss(error, logits, labels, w1, b1, w2, b2, *,
                  block_b=512, vmem_budget_bytes=12 << 20):
    """Batched MemGuard loss; each row is an independent forward of the module.

    error, logits : (B, C) float32
    labels        : (B,)   int32   (true label l per row, must be in [0, C))
    w1 : (C, H), b1 : (1, H), w2 : (H, 1), b2 : (1, 1)
    returns       : (B, 1) float32
    """
    B, C = error.shape
    H = w1.shape[1]

    # Pick rows-per-grid-step: as large as a conservative VMEM budget allows
    # (sized for v5e's 16 MiB scoped default; well under v6e/v7x), but no larger
    # than the padded batch, and a multiple of 128 lanes.
    bytes_per_col = 2 * 2 * C * 4 + 2 * 4        # 2 input streams x 2 buffers + out
    vmem_cap = max(128, (vmem_budget_bytes // bytes_per_col) // 128 * 128)
    block_b = max(128, min(_round_up(block_b, 128), vmem_cap, _round_up(B, 128)))

    Bp = _round_up(B, block_b)
    num_blocks = Bp // block_b
    pad = Bp - B

    # Batch-on-lanes layout: transpose the per-row streams to (C, B) and pad lanes.
    err_t = error.T.astype(jnp.float32)                      # (C, B)
    logits_t = logits.T.astype(jnp.float32)                  # (C, B)
    labels2d = labels.reshape(1, B).astype(jnp.int32)        # (1, B)
    if pad:
        err_t = jnp.pad(err_t, ((0, 0), (0, pad)))
        logits_t = jnp.pad(logits_t, ((0, 0), (0, pad)))
        labels2d = jnp.pad(labels2d, ((0, 0), (0, pad)))     # padded labels 0 in [0,C)

    # Defense-model params: w1^T (H, C) and one packed (H, 3) = [b1 | w2 | b2].
    w1t = w1.T.astype(jnp.float32)                           # (H, C)
    pcol = jnp.concatenate(
        [b1.reshape(H, 1),
         w2.reshape(H, 1),
         jnp.broadcast_to(b2.reshape(1, 1), (H, 1))],
        axis=1).astype(jnp.float32)                          # (H, 3)

    out = pl.pallas_call(
        memguard_kernel,
        out_shape=jax.ShapeDtypeStruct((num_blocks, block_b), jnp.float32),
        grid=(num_blocks,),
        in_specs=[
            pl.BlockSpec((C, block_b), lambda i: (0, i)),    # error^T
            pl.BlockSpec((C, block_b), lambda i: (0, i)),    # logits^T
            pl.BlockSpec((1, block_b), lambda i: (0, i)),    # labels
            pl.BlockSpec((H, C), lambda i: (0, 0)),          # w1^T (grid-invariant)
            pl.BlockSpec((H, 3), lambda i: (0, 0)),          # packed b1 | w2 | b2
        ],
        out_specs=pl.BlockSpec((1, block_b), lambda i: (i, 0)),
        compiler_params=pltpu.CompilerParams(
            dimension_semantics=("parallel",)),              # v7x: shard batch over TCs
    )(err_t, logits_t, labels2d, w1t, pcol)

    return out.reshape(Bp, 1)[:B]


def reference_loss(error, logits, labels, w1, b1, w2, b2):
    """Pure-JAX per-row mirror of the PyTorch forward (incl. the top-2 l_p logic)."""
    z = logits + error
    soft_ze = jax.nn.softmax(z, axis=1)
    soft_z = jax.nn.softmax(logits, axis=1)
    h = jnp.maximum(soft_ze @ w1 + b1, 0.0)
    new_logits = h @ w2 + b2                                 # (B, 1)
    L1 = jnp.abs(new_logits)
    top2 = jnp.argsort(-z, axis=1)[:, :2]
    l_p = jnp.where(top2[:, 0] == labels, top2[:, 1], top2[:, 0])
    z_l = jnp.take_along_axis(z, labels[:, None], axis=1)
    z_lp = jnp.take_along_axis(z, l_p[:, None], axis=1)
    L2 = jnp.maximum(-z_l + z_lp, 0.0)                       # (B, 1)
    L3 = jnp.sum(jnp.abs(soft_ze - soft_z), axis=1, keepdims=True)
    return C1 * L1 + C2 * L2 + C3 * L3


if __name__ == "__main__":
    B, num_classes, hidden = 16, 10, 32

    key = jax.random.PRNGKey(0)
    k_err, k_log, k_lab, k_w1, k_b1, k_w2, k_b2 = jax.random.split(key, 7)

    error = jax.random.normal(k_err, (B, num_classes), jnp.float32) * 0.1
    logits = jax.random.normal(k_log, (B, num_classes), jnp.float32)
    labels = jax.random.randint(k_lab, (B,), 0, num_classes, jnp.int32)

    # Deterministic synthetic defense model (num_classes -> hidden -> 1).
    w1 = jax.random.normal(k_w1, (num_classes, hidden), jnp.float32) * 0.3
    b1 = jax.random.normal(k_b1, (1, hidden), jnp.float32) * 0.1
    w2 = jax.random.normal(k_w2, (hidden, 1), jnp.float32) * 0.3
    b2 = jax.random.normal(k_b2, (1, 1), jnp.float32) * 0.1

    out = memguard_loss(error, logits, labels, w1, b1, w2, b2)
    out = jax.block_until_ready(out)

    ref = reference_loss(error, logits, labels, w1, b1, w2, b2)
    assert out.shape == (B, 1), out.shape
    assert jnp.allclose(out, ref, atol=1e-4, rtol=1e-4), (out, ref)

    print("KERNEL_OK")
</pallas_src>

<mosaic_0001>
module attributes {stable_mosaic.version = 11 : i64} {
  func.func @memguard_kernel(%arg0: i32, %arg1: memref<10x128xf32, #tpu.memory_space<vmem>>, %arg2: memref<10x128xf32, #tpu.memory_space<vmem>>, %arg3: memref<1x128xi32, #tpu.memory_space<vmem>>, %arg4: memref<32x10xf32, #tpu.memory_space<vmem>>, %arg5: memref<32x3xf32, #tpu.memory_space<vmem>>, %arg6: memref<1x128xf32, #tpu.memory_space<vmem>>) attributes {dimension_semantics = [#tpu.dimension_semantics<parallel>], iteration_bounds = array<i64: 1>, scalar_prefetch = 0 : i64, scratch_operands = 0 : i64, tpu.core_type = #tpu.core_type<tc>, window_params = [{transform_indices = @transform_0, window_bounds = array<i64: 10, 128>}, {transform_indices = @transform_1, window_bounds = array<i64: 10, 128>}, {transform_indices = @transform_2, window_bounds = array<i64: 1, 128>}, {pipeline_mode = #tpu.pipeline_mode<synchronous>, transform_indices = @transform_3, window_bounds = array<i64: 32, 10>}, {pipeline_mode = #tpu.pipeline_mode<synchronous>, transform_indices = @transform_4, window_bounds = array<i64: 32, 3>}, {transform_indices = @transform_5, window_bounds = array<i64: 1, 128>}]} {
    %c0 = arith.constant 0 : index
    %c0_0 = arith.constant 0 : index
    %0 = vector.load %arg2[%c0, %c0_0] : memref<10x128xf32, #tpu.memory_space<vmem>>, vector<10x128xf32>
    %c0_1 = arith.constant 0 : index
    %c0_2 = arith.constant 0 : index
    %1 = vector.load %arg1[%c0_1, %c0_2] : memref<10x128xf32, #tpu.memory_space<vmem>>, vector<10x128xf32>
    %2 = arith.addf %0, %1 : vector<10x128xf32>
    %cst = arith.constant dense<0xFF800000> : vector<128xf32>
    %3 = vector.multi_reduction <maximumf>, %2, %cst [0] : vector<10x128xf32> to vector<128xf32>
    %4 = vector.shape_cast %3 : vector<128xf32> to vector<1x128xf32>
    %5 = vector.broadcast %4 : vector<1x128xf32> to vector<10x128xf32>
    %6 = arith.subf %2, %5 : vector<10x128xf32>
    %7 = math.exp %6 : vector<10x128xf32>
    %cst_3 = arith.constant dense<0.000000e+00> : vector<128xf32>
    %8 = vector.multi_reduction <add>, %7, %cst_3 [0] : vector<10x128xf32> to vector<128xf32>
    %9 = vector.shape_cast %8 : vector<128xf32> to vector<1x128xf32>
    %10 = vector.broadcast %9 : vector<1x128xf32> to vector<10x128xf32>
    %11 = arith.divf %7, %10 : vector<10x128xf32>
    %cst_4 = arith.constant dense<0xFF800000> : vector<128xf32>
    %12 = vector.multi_reduction <maximumf>, %0, %cst_4 [0] : vector<10x128xf32> to vector<128xf32>
    %13 = vector.shape_cast %12 : vector<128xf32> to vector<1x128xf32>
    %14 = vector.broadcast %13 : vector<1x128xf32> to vector<10x128xf32>
    %15 = arith.subf %0, %14 : vector<10x128xf32>
    %16 = math.exp %15 : vector<10x128xf32>
    %cst_5 = arith.constant dense<0.000000e+00> : vector<128xf32>
    %17 = vector.multi_reduction <add>, %16, %cst_5 [0] : vector<10x128xf32> to vector<128xf32>
    %18 = vector.shape_cast %17 : vector<128xf32> to vector<1x128xf32>
    %19 = vector.broadcast %18 : vector<1x128xf32> to vector<10x128xf32>
    %20 = arith.divf %16, %19 : vector<10x128xf32>
    %c0_6 = arith.constant 0 : index
    %c0_7 = arith.constant 0 : index
    %21 = vector.load %arg5[%c0_6, %c0_7] : memref<32x3xf32, #tpu.memory_space<vmem>>, vector<32x1xf32>
    %c0_8 = arith.constant 0 : index
    %c1 = arith.constant 1 : index
    %22 = vector.load %arg5[%c0_8, %c1] : memref<32x3xf32, #tpu.memory_space<vmem>>, vector<32x1xf32>
    %c0_9 = arith.constant 0 : index
    %c2 = arith.constant 2 : index
    %23 = vector.load %arg5[%c0_9, %c2] : memref<32x3xf32, #tpu.memory_space<vmem>>, vector<1x1xf32>
    %c0_10 = arith.constant 0 : index
    %c0_11 = arith.constant 0 : index
    %24 = vector.load %arg4[%c0_10, %c0_11] : memref<32x10xf32, #tpu.memory_space<vmem>>, vector<32x10xf32>
    %cst_12 = arith.constant dense<0.000000e+00> : vector<32x128xf32>
    %25 = tpu.matmul %24, %11, %cst_12 {dimension_numbers = #tpu.dot_dimension_numbers<[1], [0], [0], [1], [0, 0, 1, 1], [], []>} : vector<32x10xf32>, vector<10x128xf32>, vector<32x128xf32> -> vector<32x128xf32>
    %26 = vector.broadcast %21 : vector<32x1xf32> to vector<32x128xf32>
    %27 = arith.addf %25, %26 : vector<32x128xf32>
    %cst_13 = arith.constant 0.000000e+00 : f32
    %28 = vector.broadcast %cst_13 : f32 to vector<32x128xf32>
    %29 = arith.maximumf %27, %28 : vector<32x128xf32>
    %30 = vector.broadcast %22 : vector<32x1xf32> to vector<32x128xf32>
    %31 = arith.mulf %29, %30 : vector<32x128xf32>
    %cst_14 = arith.constant dense<0.000000e+00> : vector<128xf32>
    %32 = vector.multi_reduction <add>, %31, %cst_14 [0] : vector<32x128xf32> to vector<128xf32>
    %33 = vector.shape_cast %32 : vector<128xf32> to vector<1x128xf32>
    %34 = vector.broadcast %23 : vector<1x1xf32> to vector<1x128xf32>
    %35 = arith.addf %33, %34 : vector<1x128xf32>
    %36 = math.absf %35 : vector<1x128xf32>
    %c0_15 = arith.constant 0 : index
    %c0_16 = arith.constant 0 : index
    %37 = vector.load %arg3[%c0_15, %c0_16] : memref<1x128xi32, #tpu.memory_space<vmem>>, vector<1x128xi32>
    %38 = tpu.iota {dimensions = array<i32: 0>} : vector<10x128xi32>
    %39 = vector.broadcast %37 : vector<1x128xi32> to vector<10x128xi32>
    %40 = arith.cmpi eq, %38, %39 : vector<10x128xi32>
    %cst_17 = arith.constant 0xFF800000 : f32
    %41 = vector.broadcast %cst_17 : f32 to vector<10x128xf32>
    %42 = arith.select %40, %6, %41 : vector<10x128xi1>, vector<10x128xf32>
    %cst_18 = arith.constant dense<0xFF800000> : vector<128xf32>
    %43 = vector.multi_reduction <maximumf>, %42, %cst_18 [0] : vector<10x128xf32> to vector<128xf32>
    %44 = vector.shape_cast %43 : vector<128xf32> to vector<1x128xf32>
    %cst_19 = arith.constant 0xFF800000 : f32
    %45 = vector.broadcast %cst_19 : f32 to vector<10x128xf32>
    %46 = arith.select %40, %45, %6 : vector<10x128xi1>, vector<10x128xf32>
    %cst_20 = arith.constant dense<0xFF800000> : vector<128xf32>
    %47 = vector.multi_reduction <maximumf>, %46, %cst_20 [0] : vector<10x128xf32> to vector<128xf32>
    %48 = vector.shape_cast %47 : vector<128xf32> to vector<1x128xf32>
    %49 = arith.subf %48, %44 : vector<1x128xf32>
    %cst_21 = arith.constant 0.000000e+00 : f32
    %50 = vector.broadcast %cst_21 : f32 to vector<1x128xf32>
    %51 = arith.maximumf %49, %50 : vector<1x128xf32>
    %52 = arith.subf %11, %20 : vector<10x128xf32>
    %53 = math.absf %52 : vector<10x128xf32>
    %cst_22 = arith.constant dense<0.000000e+00> : vector<128xf32>
    %54 = vector.multi_reduction <add>, %53, %cst_22 [0] : vector<10x128xf32> to vector<128xf32>
    %55 = vector.shape_cast %54 : vector<128xf32> to vector<1x128xf32>
    %cst_23 = arith.constant 1.000000e+00 : f32
    %56 = vector.broadcast %cst_23 : f32 to vector<1x128xf32>
    %57 = arith.mulf %56, %36 : vector<1x128xf32>
    %cst_24 = arith.constant 1.000000e+01 : f32
    %58 = vector.broadcast %cst_24 : f32 to vector<1x128xf32>
    %59 = arith.mulf %58, %51 : vector<1x128xf32>
    %60 = arith.addf %57, %59 : vector<1x128xf32>
    %cst_25 = arith.constant 1.000000e-01 : f32
    %61 = vector.broadcast %cst_25 : f32 to vector<1x128xf32>
    %62 = arith.mulf %61, %55 : vector<1x128xf32>
    %63 = arith.addf %60, %62 : vector<1x128xf32>
    %c0_26 = arith.constant 0 : index
    %c0_27 = arith.constant 0 : index
    %64 = vector.load %arg6[%c0_26, %c0_27] : memref<1x128xf32, #tpu.memory_space<vmem>>, vector<1x128xf32>
    tpu.vector_store %arg6[%c0_26, %c0_27], %63 {strides = array<i32>} : memref<1x128xf32, #tpu.memory_space<vmem>>, vector<1x128xf32>,
    return
  }
  func.func @transform_0(%arg0: i32) -> (i32, i32) {
    %c0_i32 = arith.constant 0 : i32
    %c0_i32_0 = arith.constant 0 : i32
    return %c0_i32, %arg0 : i32, i32
  }
  func.func @transform_1(%arg0: i32) -> (i32, i32) {
    %c0_i32 = arith.constant 0 : i32
    %c0_i32_0 = arith.constant 0 : i32
    return %c0_i32, %arg0 : i32, i32
  }
  func.func @transform_2(%arg0: i32) -> (i32, i32) {
    %c0_i32 = arith.constant 0 : i32
    %c0_i32_0 = arith.constant 0 : i32
    return %c0_i32, %arg0 : i32, i32
  }
  func.func @transform_3(%arg0: i32) -> (i32, i32) {
    %c0_i32 = arith.constant 0 : i32
    %c0_i32_0 = arith.constant 0 : i32
    %c0_i32_1 = arith.constant 0 : i32
    return %c0_i32, %c0_i32_0 : i32, i32
  }
  func.func @transform_4(%arg0: i32) -> (i32, i32) {
    %c0_i32 = arith.constant 0 : i32
    %c0_i32_0 = arith.constant 0 : i32
    %c0_i32_1 = arith.constant 0 : i32
    return %c0_i32, %c0_i32_0 : i32, i32
  }
  func.func @transform_5(%arg0: i32) -> (i32, i32) {
    %c0_i32 = arith.constant 0 : i32
    %c0_i32_0 = arith.constant 0 : i32
    return %arg0, %c0_i32 : i32, i32
  }
}

</mosaic_0001>

<bundles_post_ra>
// kernel: tpu_custom_call.1
= control target key start
LH: loop header
LB: loop body
LE: loop exit
PB: predicated region body
PF: predicated region fallthrough
CT: control target
= control target key end

     0   :  { %vm27_vm0 = vcmask 1041408   ;;  %vm107_vm1 = vcmask 80896   ;;  %v388_v10 = vmov 0   ;;  %s499_s0 = inlined_call_operand.vmem [shape: f32[10,128], index: 0, kind: input, shape index: {}]   ;;  %s500_s1 = inlined_call_operand.vmem [shape: f32[10,128], index: 1, kind: input, shape index: {}]   ;;  %s501_s2 = inlined_call_operand.vmem [shape: s32[1,128], index: 2, kind: input, shape index: {}]   ;;  %s502_s3 = inlined_call_operand.vmem [shape: f32[32,10], index: 3, kind: input, shape index: {}]   ;;  %s503_s4 = inlined_call_operand.vmem [shape: f32[32,3], index: 4, kind: input, shape index: {}]   ;;  %s504_s5 = inlined_call_operand.hbm [shape: f32[1,128], index: 5, kind: output, shape index: {}]  }
   0x1   :  { %v21_v0 = vld [vmem:[%s500_s1] sm:$0xff]  ;;  %v22_v1 = vld [vmem:[%s500_s1 + $0x8] sm:$0x3]  ;;  %v85_v9 = vld [vmem:[%s502_s3 + $0x10] sm:$0xff]  ;;  %347 = vset.pattern.permute.xlu1 %v388_v10  ;;  %346 = vset.pattern.permute.xlu0 %v388_v10 }
   0x2   :  { %v23_v2 = vld [vmem:[%s499_s0] sm:$0xff]  ;;  %v24_v3 = vld [vmem:[%s499_s0 + $0x8] sm:$0x3]  ;;  %v53_v5 = vsel %vm27_vm0, %v22_v1, -inf  ;;  %330 = vmatprep.mubr.msk.f32.mxu1 %vm107_vm1, %v85_v9  ;;  %v80_v11 = vld [vmem:[%s503_s4 + $0x10] sm:$0xff] }
   0x3   :  { %v25_v4 = vadd.f32 %v23_v2, %v21_v0  ;;  %v83_v6 = vld [vmem:[%s502_s3] sm:$0xff]  ;;  %v26_v7 = vadd.f32 %v24_v3, %v22_v1  ;;  %v54_v8 = vmax.f32 %v21_v0, %v53_v5  ;;  %99 = vperm.xlu1 %347, %v80_v11   ;;  %v81_v16 = vld [vmem:[%s503_s4 + $0x18] sm:$0xff]  ;;  %v79_v17 = vld [vmem:[%s503_s4 + $0x8] sm:$0xff] }
   0x4   :  { %327 = vmatprep.mubr.msk.f32.mxu0 %vm107_vm1, %v83_v6  ;;  %v78_v12 = vld [vmem:[%s503_s4] sm:$0xff] }
   0x5   :  { %v28_v13 = vsel %vm27_vm0, %v26_v7, -inf  ;;  %v55_v14 = vrot.slane %v54_v8, 4  ;;  %89 = vperm.xlu0 %346, %v78_v12  }
   0x6   :  { %v29_v15 = vmax.f32 %v25_v4, %v28_v13 }
   0x7   :  { %10 = vsyncpa [#allocation3], 0  ;;  %v56_v18 = vmax.f32 %v54_v8, %v55_v14  ;;  %104 = vperm.xlu1 %347, %v81_v16   ;;  %v389_v25 = vmov 1   ;;  %v82_v36 = vld [vmem:[%s503_s4] sm:$0x1]  ;;  %v390_v39 = vmov 2  }
   0x8   :  { %v30_v19 = vrot.slane %v29_v15, 4  ;;  %vm391_vm2 = vmmov 1   ;;  %v84_v5 = vld [vmem:[%s502_s3 + $0x8] sm:$0xff]  ;;  %v86_v6 = vld [vmem:[%s502_s3 + $0x18] sm:$0xff]  ;;  %v316_v14 = vld [vmem:[%s501_s2] ss:$0 sm:$0xff] }
   0x9   :  { %v57_v20 = vrot.slane %v56_v18, 2  ;;  %94 = vperm.xlu0 %346, %v79_v17   ;;  %vm334_vm3 = vmpackc.low %vm27_vm0, %vm391_vm2  ;;  %s392_s2 = smov [#allocation2]  }
   0xa   :  { %v31_v21 = vmax.f32 %v29_v15, %v30_v19  ;;  %s303_s3 = sshll.u32 %s392_s2, 4  ;;  %s304_s3 = int_to_ptr.vmem [resolvable:$true] %s303_s3 }
   0xb   :  { %v58_v22 = vmax.f32 %v56_v18, %v57_v20  ;;  %349 = vset.pattern.permute.xlu1 %v389_v25  ;;  %s364_s18 = scalar_lea.vmem %s304_s3, 16  ;;  %s368_s19 = scalar_lea.vmem %s304_s3, 32 }
   0xc   :  { %v32_v23 = vrot.slane %v31_v21, 2  ;;  %217 = vperm.xlu1 %349, %v79_v17   ;;  %p365_p0 = scmp.ne.s32.totalorder %s304_s3, %s364_s18  ;;  %p369_p1 = scmp.lt.s32.totalorder %s304_s3, %s304_s3 }
   0xd   :  { %v59_v24 = vrot.slane %v58_v22, 1  ;;  %348 = vset.pattern.permute.xlu0 %v389_v25  ;;  %p370_p2 = scmp.lt.s32.totalorder %s368_s19, %s364_s18 }
   0xe   :  { %v33_v26 = vmax.f32 %v31_v21, %v32_v23  ;;  %213 = vperm.xlu0 %348, %v78_v12  }
   0xf   :  { %v60_v27 = vmax.f32 %v58_v22, %v59_v24  ;;  %p371_p3 = por %p370_p2, %p369_p1 }
  0x10   :  { %v34_v28 = vrot.slane %v33_v26, 1  ;;  %221 = vperm.xlu1 %349, %v80_v11   ;;  %v249_v11 = vlaneseq }
  0x11   :  { %v61_v29 = vsub.f32 %v21_v0, %v60_v27  ;;  %v62_v30 = vsub.f32 %v22_v1, %v60_v27  ;;  %p372_p4 = pnand %p371_p3, %p365_p0 }
  0x12   :  { %v35_v31 = vmax.f32 %v33_v26, %v34_v28  ;;  %225 = vperm.xlu0 %348, %v81_v16   ;;  %v250_v12 = vshrl.u32 %v249_v11, 7 }
  0x13   :  { %v63_v32 = vmul.f32 1.442695, %v61_v29  ;;  %v65_v33 = vmul.f32 1.442695, %v62_v30 }
  0x14   :  { %v457_v34 = vsub.f32 %v25_v4, %v35_v31  ;;  %v459_v35 = vsub.f32 %v26_v7, %v35_v31  ;;  %350 = vset.pattern.permute.xlu1 %v390_v39  ;;  %v251_v13 = vadd.s32 8, %v250_v12  ;;  %vm256_vm5 = vcmp.eq.s32.totalorder %v250_v12, %v316_v14 }
  0x15   :  { %352 = vpow2.f32 %v63_v32  ;;  %243 = vperm.xlu1 %350, %v82_v36  }
  0x16   :  { %v38_v37 = vmul.f32 1.442695, %v457_v34  ;;  %v40_v38 = vmul.f32 1.442695, %v459_v35  ;;  %354 = vpow2.f32 %v65_v33  ;;  %351 = vset.pattern.permute.xlu0 %v390_v39  ;;  %vm257_vm4 = vcmp.eq.s32.totalorder %v251_v13, %v316_v14 }
  0x17   :  { %v259_v15 = vsel %vm257_vm4, %v459_v35, -inf  ;;  %v269_v16 = vsel %vm257_vm4, -inf, %v459_v35  ;;  %v258_v17 = vsel %vm256_vm5, %v457_v34, -inf  ;;  %v268_v21 = vsel %vm256_vm5, -inf, %v457_v34 }
  0x18   :  { %356 = vpow2.f32 %v38_v37  ;;  %v260_v18 = vsel %vm27_vm0, %v259_v15, -inf  ;;  %v270_v22 = vsel %vm27_vm0, %v269_v16, -inf }
  0x19   :  { %358 = vpow2.f32 %v40_v38  ;;  %v261_v23 = vmax.f32 %v258_v17, %v260_v18  ;;  %v271_v24 = vmax.f32 %v268_v21, %v270_v22 }
  0x1b   :  { %v262_v27 = vrot.slane %v261_v23, 4  ;;  %v272_v28 = vrot.slane %v271_v24, 4 }
  0x1d   :  { %v263_v29 = vmax.f32 %v261_v23, %v262_v27  ;;  %v273_v30 = vmax.f32 %v271_v24, %v272_v28 }
  0x1f   :  { %v353_v40 = vpop.eup %352  ;;  %v264_v39 = vrot.slane %v263_v29, 2 }
  0x20   :  { %v355_v41 = vpop.eup %354 }
  0x21   :  { %v67_v42 = vsel %vm27_vm0, %v355_v41, 0.0 }
  0x22   :  { %v357_v43 = vpop.eup %356  ;;  %v68_v44 = vadd.f32 %v353_v40, %v67_v42  ;;  %v274_v42 = vrot.slane %v273_v30, 2 }
  0x23   :  { %v359_v45 = vpop.eup %358 }
  0x24   :  { %v42_v46 = vsel %vm27_vm0, %v359_v45, 0.0  ;;  %v69_v47 = vrot.slane %v68_v44, 4 }
  0x25   :  { %v43_v48 = vadd.f32 %v357_v43, %v42_v46 }
  0x26   :  { %v70_v49 = vadd.f32 %v69_v47, %v68_v44 }
  0x27   :  { %v44_v50 = vrot.slane %v43_v48, 4 }
  0x28   :  { %v71_v51 = vrot.slane %v70_v49, 2 }
  0x29   :  { %v45_v52 = vadd.f32 %v44_v50, %v43_v48  ;;  %v265_v50 = vmax.f32 %v263_v29, %v264_v39 }
  0x2a   :  { %v72_v53 = vadd.f32 %v71_v51, %v70_v49  ;;  %v275_v51 = vmax.f32 %v273_v30, %v274_v42 }
  0x2b   :  { %v46_v54 = vrot.slane %v45_v52, 2 }
  0x2c   :  { %v73_v55 = vrot.slane %v72_v53, 1 }
  0x2d   :  { %v47_v56 = vadd.f32 %v46_v54, %v45_v52 }
  0x2e   :  { %v74_v57 = vadd.f32 %v73_v55, %v72_v53 }
  0x2f   :  { %v48_v58 = vrot.slane %v47_v56, 1 }
  0x30   :  { %360 = vrcp.f32 %v74_v57 }
  0x31   :  { %v49_v59 = vadd.f32 %v48_v58, %v47_v56 }
  0x33   :  { %362 = vrcp.f32 %v49_v59  ;;  %v266_v59 = vrot.slane %v265_v50, 1 }
  0x3a   :  { %v361_v60 = vpop.eup %360 }
  0x3b   :  { %v76_v61 = vmul.f32 %v361_v60, %v353_v40  ;;  %v77_v62 = vmul.f32 %v361_v60, %v355_v41  ;;  %v276_v60 = vrot.slane %v275_v51, 1 }
  0x3d   :  { %v363_v63 = vpop.eup %362 }
  0x3e   :  { %v51_v0 = vmul.f32 %v363_v63, %v357_v43  ;;  %v52_v1 = vmul.f32 %v363_v63, %v359_v45 }
  0x40   :  { %v333_v2 = vpack.c.bf16 %v52_v1, %v51_v0  ;;  %v280_v3 = vsub.f32 %v51_v0, %v76_v61  ;;  %v281_v4 = vsub.f32 %v52_v1, %v77_v62  ;;  %v267_v0 = vmax.f32 %v265_v50, %v266_v59 }
  0x41   :  { %v277_v1 = vmax.f32 %v275_v51, %v276_v60 }
  0x42   :  { %335 = vmatprep.subr.msk.bf16.mxu0 %vm334_vm3, %v333_v2  ;;  %339 = vmatprep.subr.msk.bf16.mxu1 %vm334_vm3, %v333_v2  ;;  %v283_v7 = vand.u32 2147483647, %v281_v4  ;;  %v282_v8 = vand.u32 2147483647, %v280_v3 }
  0x43   :  { %338 = vmatpush3.bf16.msk.msra.mxu0 %vm334_vm3, %v333_v2  ;;  %340 = vmatpush3.bf16.msk.msra.mxu1 %vm334_vm3, %v333_v2 }
  0x44   :  { %v284_v9 = vsel %vm27_vm0, %v283_v7, 0.0 }
  0x45   :  { %v285_v10 = vadd.f32 %v284_v9, %v282_v8 }
  0x46   :  { %328 = vmatmul.mubr.msk.f32.vlgmr.msra.gmra.mrb[0].mxu0 %vm107_vm1, %v84_v5  ;;  %331 = vmatmul.mubr.msk.f32.vlgmr.msra.gmra.mrb[0].mxu1 %vm107_vm1, %v86_v6  ;;  %v278_v5 = vsub.f32 %v277_v1, %v267_v0 }
  0x47   :  { %v286_v46 = vrot.slane %v285_v10, 4 }
  0x48   :  { %v279_v9 = vmax.f32 %v278_v5, 0.0 }
  0x49   :  { %v287_v56 = vadd.f32 %v286_v46, %v285_v10 }
  0x4a   :  { %v292_v14 = vmul.f32 10.0, %v279_v9 }
  0x4b   :  { %v288_v62 = vrot.slane %v287_v56, 2 }
  0x4d   :  { %v289_v3 = vadd.f32 %v288_v62, %v287_v56 }
  0x4f   :  { %v290_v7 = vrot.slane %v289_v3, 1 }
  0x51   :  { %v291_v10 = vadd.f32 %v290_v7, %v289_v3 }
  0x53   :  { %v294_v16 = vmul.f32 0.1, %v291_v10 }
  0x82   :  { %v100_v19 = vpop.permute.xlu1 %99 }
  0x84   :  { %v90_v20 = vpop.permute.xlu0 %89 }
  0x86   :  { %v105_v25 = vpop.permute.xlu1 %104 }
  0x88   :  { %v95_v26 = vpop.permute.xlu0 %94 }
  0x8b   :  { %v218_v31 = vpop.permute.xlu1 %217 }
  0x8d   :  { %v214_v32 = vpop.permute.xlu0 %213 }
  0x8f   :  { %v222_v52 = vpop.permute.xlu1 %221 }
  0x91   :  { %v226_v53 = vpop.permute.xlu0 %225 }
  0x94   :  { %v244_v11 = vpop.permute.xlu1 %243 }
 0x119   :  { %v329_v33 = vpop.f32.mrb[0].mxu0  ;;  %v332_v35 = vpop.f32.mrb[0].mxu1 }
 0x11a   :  { %v195_v36 = vadd.f32 %v329_v33, %v95_v26  ;;  %v189_v37 = vpop.f32.mrb[1].mxu0  ;;  %v199_v38 = vpop.f32.mrb[1].mxu1  ;;  %v205_v40 = vadd.f32 %v332_v35, %v105_v25 }
 0x11b   :  { %v190_v34 = vadd.f32 %v189_v37, %v90_v20  ;;  %v200_v41 = vadd.f32 %v199_v38, %v100_v19 }
 0x11c   :  { %v209_v43 = vmax.f32 %v195_v36, 0.0  ;;  %v211_v48 = vmax.f32 %v205_v40, 0.0 }
 0x11d   :  { %v208_v44 = vmax.f32 %v190_v34, 0.0  ;;  %v210_v45 = vmax.f32 %v200_v41, 0.0 }
 0x11e   :  { %v229_v47 = vmul.f32 %v218_v31, %v209_v43  ;;  %v231_v58 = vmul.f32 %v226_v53, %v211_v48 }
 0x11f   :  { %v228_v49 = vmul.f32 %v214_v32, %v208_v44  ;;  %v230_v54 = vmul.f32 %v222_v52, %v210_v45 }
 0x121   :  { %v232_v55 = vadd.f32 %v229_v47, %v228_v49 }
 0x123   :  { %v233_v57 = vadd.f32 %v232_v55, %v230_v54 }
 0x125   :  { %v234_v61 = vadd.f32 %v233_v57, %v231_v58 }
 0x127   :  { %v235_v63 = vrot.slane %v234_v61, 4 }
 0x129   :  { %v236_v2 = vadd.f32 %v235_v63, %v234_v61 }
 0x12b   :  { %v237_v4 = vrot.slane %v236_v2, 2 }
 0x12d   :  { %v238_v6 = vadd.f32 %v237_v4, %v236_v2 }
 0x12f   :  { %v239_v8 = vrot.slane %v238_v6, 1 }
 0x131   :  { %v240_v12 = vadd.f32 %v239_v8, %v238_v6 }
 0x133   :  { %v246_v13 = vadd.f32 %v244_v11, %v240_v12 }
 0x135   :  { %v247_v15 = vand.u32 2147483647, %v246_v13 }
 0x137   :  { %v293_v17 = vadd.f32 %v292_v14, %v247_v15 }
 0x139   :  { %v295_v18 = vadd.f32 %v294_v16, %v293_v17 }
 0x13b   :  { %296 = vst [vmem:[#allocation2] sm:$0x1] %v295_v18 }
 0x13c   :  { %375 = shalt.err (!%p372_p4)
}
 0x13d   :  { %s376_s22 = scalar_lea.hbm %s504_s5, 16 }
 0x13e   :  { %p377_p5 = scmp.ne.s32.totalorder %s504_s5, %s376_s22  ;;  %p380_p6 = scmp.lt.u32.totalorder %s376_s22, %s504_s5 }
 0x140   :  { %p382_p7 = pnand %p380_p6, %p377_p5 }
 0x142   :  { %385 = shalt.err (!%p382_p7)
}
 0x143   :  { %306 = dma.vmem_to_hbm [thread:$0]  %s304_s3, 16, %s504_s5, [#allocation3]  }
 0x144   :  { %386 = dma.done.wait [#allocation3], 16  }
 0x145   :  { %387 = vsyncadd [#allocation3], 4294967280 }
 0x146   :  { %310 = vsyncpa [#allocation3], 1 }

</bundles_post_ra>
